<compile_context>
chip_gen: v7x
topology: tpu7x:2x2x1
jax: 0.10.0
libtpu: 0.0.40
codegen_flags: <defaults>
</compile_context>

<pallas_src>
import math
from functools import partial

import jax
import jax.numpy as jnp
from jax import lax
from jax.experimental import pallas as pl
from jax.experimental.pallas import tpu as pltpu


def _layernorm(x, w, eps=1e-5):
    mu = jnp.mean(x, axis=-1, keepdims=True)
    var = jnp.mean((x - mu) ** 2, axis=-1, keepdims=True)
    return (x - mu) * lax.rsqrt(var + eps) * w


# ---------------------------------------------------------------------------
# Kernel 1:  q, k, v = split(LN1(x) @ Wqkv_t + bqkv)
#            (1/sqrt(dh) is pre-folded into the Q columns of Wqkv_t / bqkv on
#             the host, so no in-kernel scaling / select is needed.)
# ---------------------------------------------------------------------------
def qkv_kernel(x_ref, ln1w_ref, wqkv_ref, bqkv_ref, q_ref, k_ref, v_ref):
    x = x_ref[...].astype(jnp.float32)                          # (tq, E)
    E = x.shape[-1]

    h = _layernorm(x, ln1w_ref[...].astype(jnp.float32))        # f32 LN
    qkv = jnp.dot(h.astype(jnp.bfloat16), wqkv_ref[...],        # bf16 MXU, f32 acc
                  preferred_element_type=jnp.float32)           # (tq, 3E)
    qkv = qkv + bqkv_ref[...].astype(jnp.float32)

    q_ref[...] = qkv[:, 0:E].astype(q_ref.dtype)
    k_ref[...] = qkv[:, E:2 * E].astype(k_ref.dtype)
    v_ref[...] = qkv[:, 2 * E:3 * E].astype(v_ref.dtype)


# ---------------------------------------------------------------------------
# Kernel 2:  per (batch, q-tile): causal attention with online softmax over
#            kv tiles (causal tile skipping), one full-width out-projection,
#            residual, LN2, chunked MLP (exact erf GELU), residual.
# ---------------------------------------------------------------------------
def attn_mlp_kernel(x_ref, q_ref, k_ref, v_ref, wo_ref, bo_ref, ln2w_ref,
                    wfc_ref, wproj_ref, o_ref,
                    attn_ref, m_ref, l_ref, acc_ref,
                    *, n_head, tq, mlp_chunk):
    t = pl.program_id(1)
    E = x_ref.shape[-1]
    dh = E // n_head

    x = x_ref[...].astype(jnp.float32)                          # (tq, E)

    # Local causal mask for the diagonal kv tile, hoisted out of all loops.
    row = lax.broadcasted_iota(jnp.int32, (tq, tq), 0)
    col = lax.broadcasted_iota(jnp.int32, (tq, tq), 1)
    diag_mask = col <= row
    neg_inf = jnp.float32(-jnp.inf)

    # kv tiles are tq wide; only tiles at/below the causal diagonal are needed.
    n_kv = t + 1

    for hh in range(n_head):                                    # static offsets
        h0 = hh * dh
        qh = q_ref[:, pl.ds(h0, dh)]                            # (tq, dh) bf16 (pre-scaled)

        m_ref[...] = jnp.full((tq, 1), neg_inf, jnp.float32)
        l_ref[...] = jnp.zeros((tq, 1), jnp.float32)
        acc_ref[...] = jnp.zeros((tq, dh), jnp.float32)

        def kv_step(j, carry):
            kv0 = pl.multiple_of(j * tq, tq)
            kh = k_ref[pl.ds(kv0, tq), pl.ds(h0, dh)]           # (tq, dh) bf16
            vh = v_ref[pl.ds(kv0, tq), pl.ds(h0, dh)]           # (tq, dh) bf16

            s = lax.dot_general(qh, kh, (((1,), (1,)), ((), ())),   # q @ k^T
                                preferred_element_type=jnp.float32)  # (tq, tq)
            # Only the diagonal kv tile (j == t) needs masking.
            s = jnp.where(jnp.logical_or(j < t, diag_mask), s, neg_inf)

            m_prev = m_ref[...]
            m_new = jnp.maximum(m_prev, jnp.max(s, axis=-1, keepdims=True))
            alpha = jnp.exp(m_prev - m_new)
            p = jnp.exp(s - m_new)
            l_ref[...] = alpha * l_ref[...] + jnp.sum(p, axis=-1, keepdims=True)
            acc_ref[...] = alpha * acc_ref[...] + jnp.dot(
                p.astype(jnp.bfloat16), vh, preferred_element_type=jnp.float32)
            m_ref[...] = m_new
            return carry

        lax.fori_loop(0, n_kv, kv_step, 0)                      # dynamic trip count

        inv = pl.reciprocal(l_ref[...], approx=True)            # EUP slot
        attn_ref[:, pl.ds(h0, dh)] = (acc_ref[...] * inv).astype(attn_ref.dtype)

    # Single full-width out-projection (K = E) instead of per-head K=dh matmuls.
    attn = jnp.dot(attn_ref[...], wo_ref[...],
                   preferred_element_type=jnp.float32)          # (tq, E)
    attn = attn + bo_ref[...].astype(jnp.float32)
    x1 = x + attn                                               # residual 1

    h2 = _layernorm(x1, ln2w_ref[...].astype(jnp.float32)).astype(jnp.bfloat16)

    # MLP, chunked over the 4E hidden dim (caps the f32 (tq, 4E) temporary).
    H = wfc_ref.shape[-1]
    y = None
    for c0 in range(0, H, mlp_chunk):
        hfc = jnp.dot(h2, wfc_ref[:, pl.ds(c0, mlp_chunk)],
                      preferred_element_type=jnp.float32)       # (tq, chunk) f32
        g = jax.nn.gelu(hfc, approximate=False).astype(jnp.bfloat16)
        d = jnp.dot(g, wproj_ref[pl.ds(c0, mlp_chunk), :],
                    preferred_element_type=jnp.float32)         # (tq, E) f32
        y = d if y is None else y + d

    o_ref[...] = (x1 + y).astype(o_ref.dtype)                   # residual 2


# ---------------------------------------------------------------------------
# Wrapper
# ---------------------------------------------------------------------------
def _pick_tile(T, target=256):
    """Largest q-tile <= target that divides T and is a multiple of 16, else T."""
    if T <= target:
        return T
    for cand in range(target, 15, -16):
        if T % cand == 0:
            return cand
    return T


def _pick_mlp_chunk(H, target=2048):
    """Largest chunk <= target that divides H and is a multiple of 128, else H."""
    if H <= target:
        return H
    for cand in range(target, 127, -128):
        if H % cand == 0:
            return cand
    return H


def _vmem_limit_bytes():
    """Generation-aware VMEM limit (leave headroom for Mosaic internal scratch)."""
    cap = None
    try:
        cap = getattr(pltpu.get_tpu_info(), "vmem_capacity_bytes", None)
    except Exception:
        cap = None
    if cap is None:
        cap = 64 * 1024 * 1024
    if cap >= 96 * 1024 * 1024:          # v5e / v6e: 128 MiB physical
        return 100 * 1024 * 1024
    return 48 * 1024 * 1024              # v7x: 64 MiB physical


def gpt_block(x, params, n_head, tq=None):
    B, T, E = x.shape
    assert E % n_head == 0, "embed dim must divide by n_head"
    dh = E // n_head
    if tq is None:
        tq = _pick_tile(T)
    assert T % tq == 0, "sequence length must be divisible by the q-tile"
    nt = T // tq
    mlp_chunk = _pick_mlp_chunk(4 * E)

    bf16 = jnp.bfloat16
    scale = jnp.float32(1.0 / math.sqrt(dh))

    # Pre-transpose weights to (in, out) and fold the attention scale into the
    # Q columns / bias before the bf16 cast (zero runtime cost in the kernel).
    wqkv_t = params["wqkv"].T.astype(jnp.float32)        # (E, 3E)
    wqkv_t = wqkv_t.at[:, :E].multiply(scale)
    bqkv = params["bqkv"].astype(jnp.float32)            # (1, 3E)
    bqkv = bqkv.at[:, :E].multiply(scale)

    ln1_w = params["ln1_w"].astype(jnp.float32)          # (1, E)
    ln2_w = params["ln2_w"].astype(jnp.float32)          # (1, E)
    wqkv_t = wqkv_t.astype(bf16)                         # (E, 3E)
    wo_t = params["wo"].T.astype(bf16)                   # (E, E)
    bo = params["bo"].astype(jnp.float32)                # (1, E)
    wfc_t = params["wfc"].T.astype(bf16)                 # (E, 4E)
    wproj_t = params["wproj"].T.astype(bf16)             # (4E, E)

    vmem = _vmem_limit_bytes()

    def const_spec(shape):
        return pl.BlockSpec(shape, lambda b, t, _s=len(shape): (0,) * _s)

    # NOTE: weights are fully resident in VMEM; for very large E (v7x, 64 MiB)
    # they would need BlockSpec-level streaming over an extra grid axis.

    # ---- kernel 1: LN1 + fused QKV projection -> separate Q, K, V (bf16) ----
    q, k, v = pl.pallas_call(
        qkv_kernel,
        out_shape=(jax.ShapeDtypeStruct((B, T, E), bf16),
                   jax.ShapeDtypeStruct((B, T, E), bf16),
                   jax.ShapeDtypeStruct((B, T, E), bf16)),
        grid_spec=pltpu.PrefetchScalarGridSpec(
            num_scalar_prefetch=0,
            grid=(B, nt),
            in_specs=[
                pl.BlockSpec((None, tq, E), lambda b, t: (b, t, 0)),  # x tile
                const_spec((1, E)),          # ln1 weight
                const_spec((E, 3 * E)),      # Wqkv^T (scale pre-folded), bf16
                const_spec((1, 3 * E)),      # in_proj bias (scale pre-folded)
            ],
            out_specs=[pl.BlockSpec((None, tq, E), lambda b, t: (b, t, 0))
                       for _ in range(3)],
        ),
        compiler_params=pltpu.CompilerParams(
            dimension_semantics=("parallel", "parallel"),
            vmem_limit_bytes=vmem),
    )(x, ln1_w, wqkv_t, bqkv)

    # ---- kernel 2: attention + out-proj + residual + LN2 + MLP + residual ---
    out = pl.pallas_call(
        partial(attn_mlp_kernel, n_head=n_head, tq=tq, mlp_chunk=mlp_chunk),
        out_shape=jax.ShapeDtypeStruct((B, T, E), x.dtype),
        grid_spec=pltpu.PrefetchScalarGridSpec(
            num_scalar_prefetch=0,
            grid=(B, nt),
            in_specs=[
                pl.BlockSpec((None, tq, E), lambda b, t: (b, t, 0)),  # x q-tile
                pl.BlockSpec((None, tq, E), lambda b, t: (b, t, 0)),  # q q-tile
                pl.BlockSpec((None, T, E), lambda b, t: (b, 0, 0)),   # k (per batch)
                pl.BlockSpec((None, T, E), lambda b, t: (b, 0, 0)),   # v (per batch)
                const_spec((E, E)),          # Wo^T, bf16
                const_spec((1, E)),          # out_proj bias
                const_spec((1, E)),          # ln2 weight
                const_spec((E, 4 * E)),      # Wfc^T, bf16
                const_spec((4 * E, E)),      # Wproj^T, bf16
            ],
            out_specs=pl.BlockSpec((None, tq, E), lambda b, t: (b, t, 0)),
            scratch_shapes=[
                pltpu.VMEM((tq, E), bf16),           # per-head attention outputs
                pltpu.VMEM((tq, 1), jnp.float32),    # online-softmax running max
                pltpu.VMEM((tq, 1), jnp.float32),    # online-softmax running sum
                pltpu.VMEM((tq, dh), jnp.float32),   # online-softmax accumulator
            ],
        ),
        compiler_params=pltpu.CompilerParams(
            # batch axis parallel (balanced across TCs); seq-tile axis has
            # unequal work after causal skipping -> "arbitrary"
            dimension_semantics=("parallel", "arbitrary"),
            vmem_limit_bytes=vmem),
    )(x, q, k, v, wo_t, bo, ln2_w, wfc_t, wproj_t)
    return out


# ---------------------------------------------------------------------------
# Pure-JAX f32 reference mirroring the PyTorch forward, for verification
# ---------------------------------------------------------------------------
def reference_block(x, params, n_head):
    B, T, E = x.shape
    dh = E // n_head
    h = _layernorm(x, params["ln1_w"][0])
    qkv = h @ params["wqkv"].T + params["bqkv"][0]
    q, k, v = jnp.split(qkv, 3, axis=-1)
    q = q.reshape(B, T, n_head, dh).transpose(0, 2, 1, 3)
    k = k.reshape(B, T, n_head, dh).transpose(0, 2, 1, 3)
    v = v.reshape(B, T, n_head, dh).transpose(0, 2, 1, 3)
    # the PyTorch module adds +1.0 on allowed positions; it is a per-row
    # constant and cancels in softmax, but we add it literally anyway
    mask = jnp.where(jnp.tril(jnp.ones((T, T), bool)), 1.0, -jnp.inf)
    s = jnp.einsum("bhqd,bhkd->bhqk", q, k) / math.sqrt(dh) + mask
    p = jax.nn.softmax(s, axis=-1)
    attn = jnp.einsum("bhqk,bhkd->bhqd", p, v).transpose(0, 2, 1, 3).reshape(B, T, E)
    attn = attn @ params["wo"].T + params["bo"][0]
    x1 = x + attn
    h2 = _layernorm(x1, params["ln2_w"][0])
    y = jax.nn.gelu(h2 @ params["wfc"].T, approximate=False) @ params["wproj"].T
    return x1 + y


if __name__ == "__main__":
    # Small config consistent with GPTConfig: embed_dim_total = n_head * n_embd
    B, T = 2, 8
    n_head, n_embd = 2, 16
    E = n_head * n_embd          # 32

    key = jax.random.PRNGKey(0)
    keys = jax.random.split(key, 8)

    params = {
        "ln1_w": jnp.ones((1, E), jnp.float32),
        "ln2_w": jnp.ones((1, E), jnp.float32),
        "wqkv":  0.02 * jax.random.normal(keys[0], (3 * E, E), jnp.float32),
        "bqkv":  0.02 * jax.random.normal(keys[1], (1, 3 * E), jnp.float32),
        "wo":    0.02 * jax.random.normal(keys[2], (E, E), jnp.float32),
        "bo":    0.02 * jax.random.normal(keys[3], (1, E), jnp.float32),
        "wfc":   0.02 * jax.random.normal(keys[4], (4 * E, E), jnp.float32),
        "wproj": 0.02 * jax.random.normal(keys[5], (E, 4 * E), jnp.float32),
    }
    x = jax.random.normal(keys[6], (B, T, E), jnp.float32)

    out = jax.block_until_ready(gpt_block(x, params, n_head))

    ref = reference_block(x, params, n_head)
    assert out.shape == (B, T, E)
    max_err = float(jnp.max(jnp.abs(out - ref)))
    # bf16 MXU operands (f32 accumulation, f32 LN/softmax/GELU) -> relaxed tol
    assert jnp.allclose(out, ref, rtol=2e-2, atol=2e-2), f"mismatch vs reference: {max_err}"

    print("KERNEL_OK")
</pallas_src>

<mosaic_0001>
module attributes {stable_mosaic.version = 11 : i64} {
  func.func @qkv_kernel(%arg0: i32, %arg1: i32, %arg2: memref<1x8x32xf32, #tpu.memory_space<vmem>>, %arg3: memref<1x32xf32, #tpu.memory_space<vmem>>, %arg4: memref<32x96xbf16, #tpu.memory_space<vmem>>, %arg5: memref<1x96xf32, #tpu.memory_space<vmem>>, %arg6: memref<1x8x32xbf16, #tpu.memory_space<vmem>>, %arg7: memref<1x8x32xbf16, #tpu.memory_space<vmem>>, %arg8: memref<1x8x32xbf16, #tpu.memory_space<vmem>>) attributes {dimension_semantics = [#tpu.dimension_semantics<parallel>, #tpu.dimension_semantics<parallel>], iteration_bounds = array<i64: 2, 1>, scalar_prefetch = 0 : i64, scratch_operands = 0 : i64, tpu.core_type = #tpu.core_type<tc>, window_params = [{transform_indices = @transform_0, window_bounds = array<i64: 1, 8, 32>}, {pipeline_mode = #tpu.pipeline_mode<synchronous>, transform_indices = @transform_1, window_bounds = array<i64: 1, 32>}, {pipeline_mode = #tpu.pipeline_mode<synchronous>, transform_indices = @transform_2, window_bounds = array<i64: 32, 96>}, {pipeline_mode = #tpu.pipeline_mode<synchronous>, transform_indices = @transform_3, window_bounds = array<i64: 1, 96>}, {transform_indices = @transform_4, window_bounds = array<i64: 1, 8, 32>}, {transform_indices = @transform_5, window_bounds = array<i64: 1, 8, 32>}, {transform_indices = @transform_6, window_bounds = array<i64: 1, 8, 32>}]} {
    %c0 = arith.constant 0 : index
    %c0_0 = arith.constant 0 : index
    %c0_1 = arith.constant 0 : index
    %0 = vector.load %arg2[%c0, %c0_0, %c0_1] : memref<1x8x32xf32, #tpu.memory_space<vmem>>, vector<1x8x32xf32>
    %1 = vector.shape_cast %0 : vector<1x8x32xf32> to vector<8x32xf32>
    %c0_2 = arith.constant 0 : index
    %c0_3 = arith.constant 0 : index
    %2 = vector.load %arg3[%c0_2, %c0_3] : memref<1x32xf32, #tpu.memory_space<vmem>>, vector<1x32xf32>
    %cst = arith.constant dense<0.000000e+00> : vector<8xf32>
    %3 = vector.multi_reduction <add>, %1, %cst [1] : vector<8x32xf32> to vector<8xf32>
    %4 = vector.shape_cast %3 : vector<8xf32> to vector<8x1xf32>
    %cst_4 = arith.constant 3.200000e+01 : f32
    %5 = vector.broadcast %cst_4 : f32 to vector<8x1xf32>
    %6 = arith.divf %4, %5 : vector<8x1xf32>
    %7 = vector.broadcast %6 : vector<8x1xf32> to vector<8x32xf32>
    %8 = arith.subf %1, %7 : vector<8x32xf32>
    %9 = arith.mulf %8, %8 : vector<8x32xf32>
    %cst_5 = arith.constant dense<0.000000e+00> : vector<8xf32>
    %10 = vector.multi_reduction <add>, %9, %cst_5 [1] : vector<8x32xf32> to vector<8xf32>
    %11 = vector.shape_cast %10 : vector<8xf32> to vector<8x1xf32>
    %cst_6 = arith.constant 3.200000e+01 : f32
    %12 = vector.broadcast %cst_6 : f32 to vector<8x1xf32>
    %13 = arith.divf %11, %12 : vector<8x1xf32>
    %14 = vector.broadcast %6 : vector<8x1xf32> to vector<8x32xf32>
    %15 = arith.subf %1, %14 : vector<8x32xf32>
    %cst_7 = arith.constant 9.99999974E-6 : f32
    %16 = vector.broadcast %cst_7 : f32 to vector<8x1xf32>
    %17 = arith.addf %13, %16 : vector<8x1xf32>
    %18 = math.rsqrt %17 : vector<8x1xf32>
    %19 = vector.broadcast %18 : vector<8x1xf32> to vector<8x32xf32>
    %20 = arith.mulf %15, %19 : vector<8x32xf32>
    %21 = vector.broadcast %2 : vector<1x32xf32> to vector<8x32xf32>
    %22 = arith.mulf %20, %21 : vector<8x32xf32>
    %23 = arith.truncf %22 : vector<8x32xf32> to vector<8x32xbf16>
    %c0_8 = arith.constant 0 : index
    %c0_9 = arith.constant 0 : index
    %24 = vector.load %arg4[%c0_8, %c0_9] : memref<32x96xbf16, #tpu.memory_space<vmem>>, vector<32x96xbf16>
    %cst_10 = arith.constant dense<0.000000e+00> : vector<8x96xf32>
    %25 = tpu.matmul %23, %24, %cst_10 {dimension_numbers = #tpu.dot_dimension_numbers<[1], [0], [0], [1], [0, 0, 1, 1], [], []>} : vector<8x32xbf16>, vector<32x96xbf16>, vector<8x96xf32> -> vector<8x96xf32>
    %c0_11 = arith.constant 0 : index
    %c0_12 = arith.constant 0 : index
    %26 = vector.load %arg5[%c0_11, %c0_12] : memref<1x96xf32, #tpu.memory_space<vmem>>, vector<1x96xf32>
    %27 = vector.broadcast %26 : vector<1x96xf32> to vector<8x96xf32>
    %28 = arith.addf %25, %27 : vector<8x96xf32>
    %29 = vector.extract_strided_slice %28 {offsets = [0, 0], sizes = [8, 32], strides = [1, 1]} : vector<8x96xf32> to vector<8x32xf32>
    %30 = arith.truncf %29 : vector<8x32xf32> to vector<8x32xbf16>
    %c0_13 = arith.constant 0 : index
    %c0_14 = arith.constant 0 : index
    %c0_15 = arith.constant 0 : index
    %31 = vector.load %arg6[%c0_13, %c0_14, %c0_15] : memref<1x8x32xbf16, #tpu.memory_space<vmem>>, vector<1x8x32xbf16>
    %32 = vector.shape_cast %31 : vector<1x8x32xbf16> to vector<8x32xbf16>
    %33 = vector.shape_cast %30 : vector<8x32xbf16> to vector<1x8x32xbf16>
    tpu.vector_store %arg6[%c0_13, %c0_14, %c0_15], %33 {strides = array<i32>} : memref<1x8x32xbf16, #tpu.memory_space<vmem>>, vector<1x8x32xbf16>,
    %34 = vector.extract_strided_slice %28 {offsets = [0, 32], sizes = [8, 32], strides = [1, 1]} : vector<8x96xf32> to vector<8x32xf32>
    %35 = arith.truncf %34 : vector<8x32xf32> to vector<8x32xbf16>
    %c0_16 = arith.constant 0 : index
    %c0_17 = arith.constant 0 : index
    %c0_18 = arith.constant 0 : index
    %36 = vector.load %arg7[%c0_16, %c0_17, %c0_18] : memref<1x8x32xbf16, #tpu.memory_space<vmem>>, vector<1x8x32xbf16>
    %37 = vector.shape_cast %36 : vector<1x8x32xbf16> to vector<8x32xbf16>
    %38 = vector.shape_cast %35 : vector<8x32xbf16> to vector<1x8x32xbf16>
    tpu.vector_store %arg7[%c0_16, %c0_17, %c0_18], %38 {strides = array<i32>} : memref<1x8x32xbf16, #tpu.memory_space<vmem>>, vector<1x8x32xbf16>,
    %39 = vector.extract_strided_slice %28 {offsets = [0, 64], sizes = [8, 32], strides = [1, 1]} : vector<8x96xf32> to vector<8x32xf32>
    %40 = arith.truncf %39 : vector<8x32xf32> to vector<8x32xbf16>
    %c0_19 = arith.constant 0 : index
    %c0_20 = arith.constant 0 : index
    %c0_21 = arith.constant 0 : index
    %41 = vector.load %arg8[%c0_19, %c0_20, %c0_21] : memref<1x8x32xbf16, #tpu.memory_space<vmem>>, vector<1x8x32xbf16>
    %42 = vector.shape_cast %41 : vector<1x8x32xbf16> to vector<8x32xbf16>
    %43 = vector.shape_cast %40 : vector<8x32xbf16> to vector<1x8x32xbf16>
    tpu.vector_store %arg8[%c0_19, %c0_20, %c0_21], %43 {strides = array<i32>} : memref<1x8x32xbf16, #tpu.memory_space<vmem>>, vector<1x8x32xbf16>,
    return
  }
  func.func @transform_0(%arg0: i32, %arg1: i32) -> (i32, i32, i32) {
    %c0_i32 = arith.constant 0 : i32
    %c0_i32_0 = arith.constant 0 : i32
    return %arg0, %arg1, %c0_i32 : i32, i32, i32
  }
  func.func @transform_1(%arg0: i32, %arg1: i32) -> (i32, i32) {
    %c0_i32 = arith.constant 0 : i32
    %c0_i32_0 = arith.constant 0 : i32
    %c0_i32_1 = arith.constant 0 : i32
    return %c0_i32, %c0_i32_0 : i32, i32
  }
  func.func @transform_2(%arg0: i32, %arg1: i32) -> (i32, i32) {
    %c0_i32 = arith.constant 0 : i32
    %c0_i32_0 = arith.constant 0 : i32
    %c0_i32_1 = arith.constant 0 : i32
    return %c0_i32, %c0_i32_0 : i32, i32
  }
  func.func @transform_3(%arg0: i32, %arg1: i32) -> (i32, i32) {
    %c0_i32 = arith.constant 0 : i32
    %c0_i32_0 = arith.constant 0 : i32
    %c0_i32_1 = arith.constant 0 : i32
    return %c0_i32, %c0_i32_0 : i32, i32
  }
  func.func @transform_4(%arg0: i32, %arg1: i32) -> (i32, i32, i32) {
    %c0_i32 = arith.constant 0 : i32
    %c0_i32_0 = arith.constant 0 : i32
    return %arg0, %arg1, %c0_i32 : i32, i32, i32
  }
  func.func @transform_5(%arg0: i32, %arg1: i32) -> (i32, i32, i32) {
    %c0_i32 = arith.constant 0 : i32
    %c0_i32_0 = arith.constant 0 : i32
    return %arg0, %arg1, %c0_i32 : i32, i32, i32
  }
  func.func @transform_6(%arg0: i32, %arg1: i32) -> (i32, i32, i32) {
    %c0_i32 = arith.constant 0 : i32
    %c0_i32_0 = arith.constant 0 : i32
    return %arg0, %arg1, %c0_i32 : i32, i32, i32
  }
}

</mosaic_0001>

<bundles_post_ra>
// kernel: tpu_custom_call.1
= control target key start
LH: loop header
LB: loop body
LE: loop exit
PB: predicated region body
PF: predicated region fallthrough
CT: control target
= control target key end

     0   :  { %s1322_s0 = inlined_call_operand.hbm [shape: f32[2,8,32], index: 0, kind: input, shape index: {}]   ;;  %s1323_s1 = inlined_call_operand.vmem [shape: f32[1,32], index: 1, kind: input, shape index: {}]   ;;  %s1324_s2 = inlined_call_operand.hbm [shape: bf16[32,96], index: 2, kind: input, shape index: {}]   ;;  %s1325_s3 = inlined_call_operand.vmem [shape: f32[1,96], index: 3, kind: input, shape index: {}]   ;;  %s1326_s4 = inlined_call_operand.hbm [shape: bf16[2,8,32], index: 4, kind: output, shape index: {0}]   ;;  %s1327_s5 = inlined_call_operand.hbm [shape: bf16[2,8,32], index: 5, kind: output, shape index: {1}]   ;;  %s1328_s6 = inlined_call_operand.hbm [shape: bf16[2,8,32], index: 6, kind: output, shape index: {2}]  }
   0x1   :  { %1333 = sst [smem:[#allocation15_spill]] %s1324_s2 }
   0x2   :  { %12 = vsyncpa [#allocation3], 0 }
   0x3   :  { %14 = vsyncpa [#allocation3 + $0x1], 0 }
   0x4   :  { %15 = vsyncpa [#allocation6], 0 }
   0x5   :  { %16 = vsyncpa [#allocation4], 0 }
   0x6   :  { %18 = vsyncpa [#allocation4 + $0x1], 0 }
   0x7   :  { %19 = vsyncpa [#allocation9], 0 }
   0x8   :  { %21 = vsyncpa [#allocation9 + $0x1], 0  ;;  %s1017_s21 = smov 0   ;;  %s1019_s22 = smov 0  }
   0x9   :  { %s1021_s23 = smov 0   ;;  %s1023_s24 = smov 0  }
   0xa   :  { %s1025_s25 = smov 0   ;;  %s1027_s26 = smov 0  }
   0xb LB: > { %s1048_s27 = sadd.s32 4294967295, %s969_s26   ;;  %s1332_s28 = sadd.s32 4294967294, %s969_s26   ;;  %s969_s26 = sphi %s1027_s26, %s27_s26   ;;  %s965_s25 = sphi %s1025_s25, %s1354_s25   ;;  %s961_s24 = sphi %s1023_s24, %s1353_s24   ;;  %s957_s23 = sphi %s1021_s23, %s1352_s23   ;;  %s953_s22 = sphi %s1019_s22, %s1351_s22   ;;  %s949_s21 = sphi %s1017_s21, %s1350_s21  }
   0xc   : > { %p61_p0 = scmp.ne.s32.totalorder %s953_s22, %s949_s21  ;;  %p1329_p1 = scmp.eq.s32.totalorder %s1048_s27, 0 }
   0xd   : > { %p156_p3 = scmp.eq.s32.totalorder %s1332_s28, 1  ;;  %p635_p5 = scmp.ge.s32.totalorder %s969_s26, 1 }
   0xe   : > { %p1059_p4 = por %p1329_p1, %p61_p0  ;;  %p219_p7 = scmp.lt.s32.totalorder %s969_s26, 3 }
   0xf   : > { %p1064_p6 = por %p156_p3, %p61_p0  ;;  %s971_s8 = smov [#allocation5]  }
  0x10   : > { %s1334_s29 = scalar_select %p1059_p4, 1, 0 }
  0x11   : > { %s1335_s30 = scalar_select %p1064_p6, 1, 0 }
  0x12   : > { %p1069_p8 = pnand %p635_p5, %p219_p7  ;;  %s234_s9 = sshll.u32 %s971_s8, 4  ;;  %s235_s9 = int_to_ptr.vmem [resolvable:$true] %s234_s9 }
  0x13   : > { %s39_s11 = sadd.s32 1, %s965_s25  ;;  %s1338_s2 = sld [smem:[#allocation15_spill]] }
  0x14   : > { %s1336_s7 = scalar_select %p1069_p8, 1, 0 }
  0x15   : > { %p684_p9 = pneg %p1069_p8 }
  0x17   : > { %p1078_p11 = pnand %p684_p9, %p1329_p1 }
  0x19   : > { %s765_s14 = scalar_lea.hbm %s1338_s2, 256  ;;  %p767_p13 = pneg %p1078_p11 }
  0x1a   : > { %p766_p12 = scmp.ne.s32.totalorder %s1338_s2, %s765_s14  ;;  %p772_p5 = scmp.lt.u32.totalorder %s765_s14, %s1338_s2 }
  0x1c   : > { %p768_p0 = pnand %p767_p13, %p766_p12 }
  0x1e   : > { %p769_p3 = pneg %p768_p0 }
  0x20   : > { %p774_p7 = pnand %p772_p5, %p769_p3 }
  0x22   : > { %777 = shalt.err (!%p774_p7)
}
  0x23   : > { %s778_s19 = scalar_lea.vmem %s235_s9, 256  ;;  %p786_p2 = scmp.lt.s32.totalorder %s235_s9, %s235_s9 }
  0x24   : > { %p779_p9 = scmp.ne.s32.totalorder %s235_s9, %s778_s19  ;;  %p787_p6 = scmp.lt.s32.totalorder %s778_s19, %s778_s19 }
  0x26   : > { %p781_p10 = pnand %p779_p9, %p767_p13  ;;  %p788_p4 = por %p787_p6, %p786_p2 }
  0x28   : > { %p782_p1 = pneg %p781_p10 }
  0x2a   : > { %p789_p8 = pnand %p788_p4, %p782_p1 }
  0x2c   : > { %792 = shalt.err (!%p789_p8)
}
  0x2d   : > { %s972_s20 = smov 64   ;;  %s973_s8 = smov 4  }
  0x2e   : > { %687 = dma.hbm_to_vmem [thread:$0]  (!%p1078_p11), %s1338_s2, 256, %s235_s9, [#allocation6], %s972_s20, %s972_s20, %s973_s8  }
  0x2f   : > { %p41_p1 = scmp.ge.s32.totalorder %s39_s11, 2  ;;  %s48_s14 = sadd.s32 1, %s957_s23 }
  0x30   : > { %p55_p2 = scmp.ne.s32.totalorder %s957_s23, %s953_s22  ;;  %p56_p4 = scmp.eq.s32.totalorder %s969_s26, 0 }
  0x31   : > { %s1356_s11 = smov (%p41_p1, %s39_s11), 0  ;;  %p1340_p8 = scmp.eq.s32.totalorder %s1048_s27, 1 }
  0x32   : > { %p1105_p6 = por %p56_p4, %p55_p2  ;;  %s43_s10 = ssub.s32 %s965_s25, %s1356_s11 }
  0x33   : > { %p1111_p10 = por %p1340_p8, %p55_p2  ;;  %p703_p12 = scmp.lt.s32.totalorder %s969_s26, 2 }
  0x34   : > { %p46_p11 = scmp.eq.s32.totalorder %s43_s10, 0  ;;  %s251_s9 = sand.u32 1, %s957_s23  }
  0x35   : > { %s638_s17 = sshll.u32 %s251_s9, 3  ;;  %s639_s19 = sshll.u32 %s965_s25, 7 }
  0x36   : > { %s1120_s18 = scalar_select %p46_p11, %s957_s23, %s48_s14  }
  0x37   : > { %s1126_s12 = scalar_lea.hbm %s1322_s0, %s639_s19  ;;  %s255_s13 = scalar_lea.vmem [#allocation2], %s638_s17 }
  0x38   : > { %s263_s28 = sshll.u32 %s255_s13, 4  ;;  %p1132_p13 = pnand %p703_p12, %p1105_p6  ;;  %s1128_s28 = int_to_ptr.vmem [resolvable:$true] %s263_s28 }
  0x39   : > { %s252_s14 = scalar_lea.sflag [#allocation3], %s251_s9  ;;  %s793_s2 = scalar_lea.hbm %s1126_s12, 128 }
  0x3a   : > { %p794_p0 = scmp.ne.s32.totalorder %s1126_s12, %s793_s2  ;;  %p795_p3 = pneg %p1132_p13 }
  0x3b   : > { %s798_s20 = scalar_lea.hbm %s1322_s0, 256  ;;  %p799_p9 = scmp.lt.u32.totalorder %s1126_s12, %s1322_s0 }
  0x3c   : > { %p796_p5 = pnand %p795_p3, %p794_p0  ;;  %p800_p1 = scmp.lt.u32.totalorder %s798_s20, %s793_s2 }
  0x3d   : > { %p802_p4 = scmp.lt.u32.totalorder %s793_s2, %s1126_s12 }
  0x3e   : > { %p797_p7 = pneg %p796_p5  ;;  %p801_p2 = por %p800_p1, %p799_p9 }
  0x40   : > { %p803_p6 = por %p802_p4, %p801_p2 }
  0x42   : > { %p804_p8 = pnand %p803_p6, %p797_p7 }
  0x44   : > { %807 = shalt.err (!%p804_p8)
}
  0x45   : > { %s808_s9 = scalar_lea.vmem %s1128_s28, 128  ;;  %s974_s13 = smov [#allocation2]  }
  0x46   : > { %p809_p12 = scmp.ne.s32.totalorder %s1128_s28, %s808_s9  ;;  %s813_s17 = sshll.u32 %s974_s13, 4  ;;  %s814_s17 = int_to_ptr.vmem [resolvable:$false] %s813_s17 }
  0x47   : > { %s815_s19 = scalar_lea.vmem %s814_s17, 256  ;;  %p816_p5 = scmp.lt.s32.totalorder %s1128_s28, %s814_s17 }
  0x48   : > { %p811_p11 = pnand %p809_p12, %p795_p3  ;;  %p817_p9 = scmp.lt.s32.totalorder %s815_s19, %s808_s9 }
  0x4a   : > { %p812_p0 = pneg %p811_p11  ;;  %p818_p1 = por %p817_p9, %p816_p5 }
  0x4c   : > { %p819_p2 = pnand %p818_p1, %p812_p0 }
  0x4e   : > { %822 = shalt.err (!%p819_p2)
}
  0x4f   : > { %691 = dma.hbm_to_vmem [thread:$0]  (!%p1132_p13), %s1126_s12, 128, %s1128_s28, %s252_s14  }
  0x50   : > { %p1343_p7 = scmp.ne.s32.totalorder %s1336_s7, 0 }
  0x51   : > { %s1164_s2 = sand.u32 (!%p1343_p7), 1, %s953_s22   ;;  %p1344_p3 = scmp.ne.s32.totalorder (!%p1343_p7), %s1334_s29, 0 }
  0x52   : > { %272 = sbr.rel (%p1343_p7) target bundleno = 775 (0x307), region = 36  ;;  %s641_s20 = sshll.u32 (!%p1343_p7), %s1164_s2, 3 }
  0x53   : > { %s275_s15 = scalar_lea.sflag (!%p1343_p7), [#allocation3], %s1164_s2  ;;  %s278_s8 = scalar_lea.vmem (!%p1343_p7), [#allocation2], %s641_s20 }
  0x59   : > { %932 = dma.done.wait (%p1344_p3), %s275_s15, 128  }
  0x5a   : > { %934 = vsyncadd (%p1344_p3), %s275_s15, 4294967168  ;;  %p1345_p4 = scmp.eq.s32.totalorder %s1048_s27, 0 }
  0x5c   : > { %936 = dma.done.wait (%p1345_p4), [#allocation6], 256   ;;  %p1346_p13 = pmov %p1345_p4 }
  0x5d   : > { %vm324_vm0 = vcmask 261120   ;;  %v322_v0 = vld [vmem:[%s278_s8] sm:$0xff]  ;;  %v761_v7 = vld [vmem:[#allocation5] sm:$0xff]   ;;  %v975_v8 = vmov 0.0   ;;  %vm976_vm1 = vmmov 0   ;;  %v762_v9 = vld [vmem:[#allocation5 + $0x8] sm:$0xff]  }
  0x5e   : > { %938 = vsyncadd (%p1346_p13), [#allocation6], 4294967040  ;;  %v325_v1 = vsel %vm324_vm0, %v322_v0, 0.0  ;;  %664 = vmatprep.subr.bf16.mxu0 %v975_v8  ;;  %668 = vmatprep.mubr.msk.bf16.mxu0 %vm976_vm1, %v975_v8  ;;  %v646_v14 = vld [vmem:[%s1323_s1] ss:$0 sm:$0xff]  ;;  %s1183_s7 = sshll.u32 %s1164_s2, 2 }
  0x5f   : > { %326 = vadd.xlane.f32.xlu0 %v325_v1  ;;  %665 = vmatpush3.bf16.msra.mxu0 %v761_v7  ;;  %v647_v18 = vld [vmem:[%s1325_s3] ss:$0 sm:$0xff]  ;;  %s1189_s14 = sshll.u32 %s961_s24, 6  ;;  %s306_s9 = scalar_lea.vmem [#allocation7], %s1183_s7  ;;  %vm414_vm2 = vcmask 257024  }
  0x60   : > { %666 = vmatprep.subr.bf16.mxu0 %v975_v8  ;;  %s452_s13 = sshll.u32 %s306_s9, 4  ;;  %s1196_s20 = scalar_lea.hbm %s1326_s4, %s1189_s14  ;;  %s1198_s13 = int_to_ptr.vmem [resolvable:$true] %s452_s13 }
  0x61   : > { %s977_s24 = smov 96   ;;  %s428_s15 = scalar_lea.sflag [#allocation4], %s1164_s2 }
  0x62   : > { %s823_s8 = scalar_lea.vmem %s1198_s13, 64  ;;  %s978_s28 = smov [#allocation7]  }
  0x63   : > { %667 = vmatpush3.bf16.msra.mxu0 %v762_v9  ;;  %p824_p6 = scmp.ne.s32.totalorder %s1198_s13, %s823_s8  ;;  %s827_s29 = sshll.u32 %s978_s28, 4  ;;  %s828_s29 = int_to_ptr.vmem [resolvable:$false] %s827_s29 }
  0x64   : > { %s829_s12 = scalar_lea.vmem %s828_s29, 128  ;;  %p830_p11 = scmp.lt.s32.totalorder %s1198_s13, %s828_s29 }
  0x65   : > { %p825_p8 = pnand %p824_p6, %p1111_p10  ;;  %p831_p0 = scmp.lt.s32.totalorder %s829_s12, %s823_s8 }
  0x67   : > { %p826_p12 = pneg %p825_p8  ;;  %p832_p5 = por %p831_p0, %p830_p11 }
  0x69   : > { %p833_p9 = pnand %p832_p5, %p826_p12 }
  0xec   : > { %v327_v2 = vpop.xlane.xlu0 %326 }
  0xed   : > { %v329_v3 = vmul.f32 0.03125, %v327_v2 }
  0xef   : > { %v330_v4 = vsub.f32 %v322_v0, %v329_v3 }
  0xf1   : > { %v331_v5 = vmul.f32 %v330_v4, %v330_v4 }
  0xf3   : > { %v332_v6 = vsel %vm324_vm0, %v331_v5, 0.0 }
  0xf4   : > { %333 = vadd.xlane.f32.xlu0 %v332_v6 }
 0x181   : > { %v334_v10 = vpop.xlane.xlu0 %333 }
 0x182   : > { %v335_v11 = vmul.f32 0.03125, %v334_v10 }
 0x184   : > { %v336_v12 = vadd.f32 1e-05, %v335_v11 }
 0x186   : > { %763 = vrsqrt.f32 %v336_v12 }
 0x190   : > { %v764_v13 = vpop.eup %763 }
 0x191   : > { %v338_v15 = vmul.f32 %v764_v13, %v330_v4 }
 0x193   : > { %v345_v16 = vmul.f32 %v646_v14, %v338_v15 }
 0x195   : > { %v346_v17 = vpack.c.bf16 %v345_v16, %v345_v16 }
 0x197   : > { %669 = vmatmul.mubr.msk.bf16.vlgmr.msra.gmra.mrb[0].mxu0 %vm324_vm0, %v346_v17 }
 0x26a   : > { %v407_v19 = vpop.f32.mrb[0].mxu0 }
 0x26b   : > { %v408_v20 = vadd.f32 %v647_v18, %v407_v19  ;;  %v670_v21 = vpop.f32.mrb[1].mxu0 }
 0x26c   : > { %v410_v22 = vpop.f32.mrb[2].mxu0 }
 0x26d   : > { %v413_v23 = vpack.c.bf16 %v408_v20, %v408_v20  ;;  %v671_v24 = vpop.f32.mrb[3].mxu0 }
 0x26f   : > { %419 = vrot.lane.b32.xlu1 %v413_v23, %s977_s24  ;;  %415 = vst.msk [vmem:[%s306_s9] sm:$0xf] %vm414_vm2, %v413_v23 }
 0x270   : > { %836 = shalt.err (!%p833_p9)
}
 0x271   : > { %s837_s2 = scalar_lea.hbm %s1196_s20, 64  ;;  %s841_s17 = scalar_lea.hbm %s1326_s4, 128 }
 0x272   : > { %p838_p1 = scmp.ne.s32.totalorder %s1196_s20, %s837_s2  ;;  %p842_p3 = scmp.lt.u32.totalorder %s1196_s20, %s1326_s4 }
 0x273   : > { %p843_p4 = scmp.lt.u32.totalorder %s841_s17, %s837_s2  ;;  %p845_p6 = scmp.lt.u32.totalorder %s837_s2, %s1196_s20 }
 0x274   : > { %p839_p2 = pnand %p838_p1, %p1111_p10 }
 0x275   : > { %p844_p13 = por %p843_p4, %p842_p3 }
 0x276   : > { %p840_p7 = pneg %p839_p2 }
 0x277   : > { %p846_p8 = por %p845_p6, %p844_p13 }
 0x279   : > { %p847_p12 = pnand %p846_p8, %p840_p7 }
 0x27b   : > { %850 = shalt.err (!%p847_p12)
}
 0x27c   : > { %678 = dma.vmem_to_hbm [thread:$0]  (%p1111_p10), %s1198_s13, 64, %s1196_s20, %s428_s15  }
 0x27d   : > { %s979_s8 = smov 64   ;;  %s432_s28 = sand.u32 1, %s1048_s27  }
 0x27e   : > { %423 = vrot.lane.b32.xlu1 %v413_v23, %s979_s8  ;;  %s313_s29 = scalar_lea.vmem [#allocation8], %s1183_s7  ;;  %s1229_s9 = scalar_lea.hbm %s1327_s5, %s1189_s14 }
 0x27f   : > { %s466_s12 = sshll.u32 %s313_s29, 4  ;;  %s320_s17 = scalar_lea.vmem [#allocation10], %s1183_s7  ;;  %s1231_s12 = int_to_ptr.vmem [resolvable:$true] %s466_s12 }
 0x280   : > { %s1236_s19 = sshll.u32 %s320_s17, 4  ;;  %s1239_s27 = scalar_lea.sflag [#allocation9], %s432_s28  ;;  %s1270_s19 = int_to_ptr.vmem [resolvable:$true] %s1236_s19 }
 0x281   : > { %s851_s13 = scalar_lea.vmem %s1231_s12, 64  ;;  %s980_s20 = smov [#allocation8]  }
 0x282   : > { %p852_p11 = scmp.ne.s32.totalorder %s1231_s12, %s851_s13  ;;  %s855_s15 = sshll.u32 %s980_s20, 4  ;;  %s856_s15 = int_to_ptr.vmem [resolvable:$false] %s855_s15 }
 0x283   : > { %s857_s24 = scalar_lea.vmem %s856_s15, 128  ;;  %p858_p9 = scmp.lt.s32.totalorder %s1231_s12, %s856_s15 }
 0x284   : > { %p853_p0 = pnand %p852_p11, %p1111_p10  ;;  %p859_p1 = scmp.lt.s32.totalorder %s857_s24, %s851_s13 }
 0x286   : > { %p854_p5 = pneg %p853_p0  ;;  %p860_p2 = por %p859_p1, %p858_p9 }
 0x288   : > { %p861_p7 = pnand %p860_p2, %p854_p5 }
 0x2e1   : > { %v420_v25 = vpop.permute.xlu1 %419 }
 0x2e2   : > { %422 = vst.msk [vmem:[%s313_s29] sm:$0xf] %vm414_vm2, %v420_v25 }
 0x2e3   : > { %864 = shalt.err (!%p861_p7)
}
 0x2e4   : > { %s865_s8 = scalar_lea.hbm %s1229_s9, 64  ;;  %s869_s2 = scalar_lea.hbm %s1327_s5, 128 }
 0x2e5   : > { %p866_p3 = scmp.ne.s32.totalorder %s1229_s9, %s865_s8  ;;  %p870_p6 = scmp.lt.u32.totalorder %s1229_s9, %s1327_s5 }
 0x2e6   : > { %p871_p8 = scmp.lt.u32.totalorder %s869_s2, %s865_s8  ;;  %p873_p11 = scmp.lt.u32.totalorder %s865_s8, %s1229_s9 }
 0x2e7   : > { %p867_p4 = pnand %p866_p3, %p1111_p10 }
 0x2e8   : > { %p872_p12 = por %p871_p8, %p870_p6 }
 0x2e9   : > { %p868_p13 = pneg %p867_p4 }
 0x2ea   : > { %p874_p0 = por %p873_p11, %p872_p12 }
 0x2ec   : > { %p875_p5 = pnand %p874_p0, %p868_p13 }
 0x2ee   : > { %878 = shalt.err (!%p875_p5)
}
 0x2ef   : > { %679 = dma.vmem_to_hbm [thread:$0]  (%p1111_p10), %s1231_s12, 64, %s1229_s9, %s1239_s27  }
 0x2f0   : > { %s1267_s24 = scalar_lea.hbm %s1328_s6, %s1189_s14  ;;  %v424_v26 = vpop.permute.xlu1 %423  ;;  %s879_s8 = scalar_lea.vmem %s1270_s19, 64 }
 0x2f1   : > { %426 = vst.msk [vmem:[%s320_s17] sm:$0xf] %vm414_vm2, %v424_v26  ;;  %p880_p9 = scmp.ne.s32.totalorder %s1270_s19, %s879_s8  ;;  %s981_s12 = smov [#allocation10]  }
 0x2f2   : > { %s883_s9 = sshll.u32 %s981_s12, 4  ;;  %s884_s9 = int_to_ptr.vmem [resolvable:$false] %s883_s9 }
 0x2f3   : > { %p881_p1 = pnand %p880_p9, %p1111_p10  ;;  %s885_s28 = scalar_lea.vmem %s884_s9, 128 }
 0x2f4   : > { %p886_p7 = scmp.lt.s32.totalorder %s1270_s19, %s884_s9  ;;  %p887_p3 = scmp.lt.s32.totalorder %s885_s28, %s879_s8 }
 0x2f5   : > { %p882_p2 = pneg %p881_p1 }
 0x2f6   : > { %p888_p4 = por %p887_p3, %p886_p7 }
 0x2f8   : > { %p889_p13 = pnand %p888_p4, %p882_p2 }
 0x2fa   : > { %892 = shalt.err (!%p889_p13)
}
 0x2fb   : > { %s893_s7 = scalar_lea.hbm %s1267_s24, 64  ;;  %s897_s29 = scalar_lea.hbm %s1328_s6, 128 }
 0x2fc   : > { %p894_p6 = scmp.ne.s32.totalorder %s1267_s24, %s893_s7  ;;  %p898_p11 = scmp.lt.u32.totalorder %s1267_s24, %s1328_s6 }
 0x2fd   : > { %p899_p0 = scmp.lt.u32.totalorder %s897_s29, %s893_s7  ;;  %p901_p9 = scmp.lt.u32.totalorder %s893_s7, %s1267_s24 }
 0x2fe   : > { %p895_p8 = pnand %p894_p6, %p1111_p10 }
 0x2ff   : > { %p900_p5 = por %p899_p0, %p898_p11 }
 0x300   : > { %p896_p12 = pneg %p895_p8 }
 0x301   : > { %p902_p1 = por %p901_p9, %p900_p5 }
 0x303   : > { %p903_p2 = pnand %p902_p1, %p896_p12 }
 0x305   : > { %906 = shalt.err (!%p903_p2)
}
 0x306   : > { %680 = dma.vmem_to_hbm [thread:$0]  (%p1111_p10), %s1270_s19, 64, %s1267_s24, %s1239_s27  }
 0x307 PF: > { %s492_s20 = sand.u32 1, %s949_s21   ;;  %p1347_p7 = scmp.ne.s32.totalorder %s1335_s30, 0 }
 0x308   : > { %p1348_p3 = scmp.ge.s32.totalorder %s969_s26, 2  ;;  %s493_s13 = scalar_lea.sflag [#allocation4], %s492_s20 }
 0x30a   : > { %p693_p4 = pnand %p1348_p3, %p1347_p7 }
 0x30c   : > { %940 = dma.done.wait (!%p693_p4), %s493_s13, 64  }
 0x30d   : > { %942 = vsyncadd (!%p693_p4), %s493_s13, 4294967232  ;;  %s1349_s15 = sadd.s32 4294967294, %s969_s26  }
 0x30e   : > { %s501_s8 = sand.u32 1, %s1349_s15  }
 0x30f   : > { %s502_s12 = scalar_lea.sflag [#allocation9], %s501_s8 }
 0x310   : > { %944 = dma.done.wait (!%p693_p4), %s502_s12, 128  }
 0x311   : > { %946 = vsyncadd (!%p693_p4), %s502_s12, 4294967168  ;;  %s27_s26 = sadd.s32 1, %s969_s26   ;;  %s1350_s21 = smov %s953_s22 }
 0x312   : > { %p24_p10 = scmp.ge.s32.totalorder %s27_s26, 4   ;;  %s1351_s22 = smov %s957_s23 }
 0x313   : > { %s1352_s23 = smov %s1120_s18  ;;  %s1353_s24 = smov %s965_s25 }
 0x314   : > { %s1354_s25 = smov %s1356_s11  ;;  %26 = sbr.rel (!%p24_p10) target bundleno = 11 (0xb), region = 117 }
 0x31b   :  { %516 = vsyncpa [#allocation3], 1 }
 0x31c   :  { %518 = vsyncpa [#allocation3 + $0x1], 1 }
 0x31d   :  { %519 = vsyncpa [#allocation6], 1 }
 0x31e   :  { %520 = vsyncpa [#allocation4], 1 }
 0x31f   :  { %522 = vsyncpa [#allocation4 + $0x1], 1 }
 0x320   :  { %523 = vsyncpa [#allocation9], 1 }
 0x321   :  { %525 = vsyncpa [#allocation9 + $0x1], 1 }

</bundles_post_ra>
